<compile_context>
chip_gen: v6e
topology: v6e:2x2x1
jax: 0.10.0
libtpu: 0.0.40
codegen_flags: <defaults>
</compile_context>

<pallas_src>
import functools

import jax
import jax.numpy as jnp
import numpy as np
from jax.experimental import pallas as pl
from jax.experimental.pallas import tpu as pltpu


# ----------------------------------------------------------------------------
# helpers
# ----------------------------------------------------------------------------
def _vmem_capacity():
    """Physical VMEM bytes of the current chip (fallback: 64 MiB)."""
    try:
        info = pltpu.get_tpu_info()
        cap = getattr(info, "vmem_capacity_bytes", None)
        if cap:
            return int(cap)
    except Exception:
        pass
    return 64 << 20


# ----------------------------------------------------------------------------
# Linear kernel:  y = x @ W^T + b   (used for wq, wk, wv and the final dense)
# ----------------------------------------------------------------------------
def _linear_kernel(x_ref, wt_ref, b_ref, o_ref):
    o_ref[...] = (
        jnp.dot(x_ref[...], wt_ref[...], preferred_element_type=jnp.float32)
        + b_ref[...]
    ).astype(o_ref.dtype)


def _pallas_linear(x2d, w, b, *, out_dtype=jnp.float32):
    """x2d: (M, Din); w: (Dout, Din) PyTorch Linear layout; b: (1, Dout)."""
    M, Din = x2d.shape
    Dout = w.shape[0]
    wt = jnp.asarray(w).T                       # (Din, Dout): no in-kernel .T
    b2 = jnp.asarray(b).reshape(1, Dout)

    tm = M
    for cand in (512, 256, 128, 64, 32, 16, 8):
        if M % cand == 0:
            tm = cand
            break
    grid = (M // tm,)

    # Blocks: x (tm,Din), wt (Din,Dout), b (1,Dout), out (tm,Dout); ×2 buffers.
    need = 2 * 4 * (tm * Din + Din * Dout + Dout + tm * Dout) + 4 * tm * Dout
    vmem_limit = int(min(max(need, 32 << 20), _vmem_capacity()))
    # TODO(synk): tile the Dout dimension as well for very large d_model.

    return pl.pallas_call(
        _linear_kernel,
        grid=grid,
        in_specs=[
            pl.BlockSpec((tm, Din), lambda i: (i, 0)),
            pl.BlockSpec((Din, Dout), lambda i: (0, 0)),
            pl.BlockSpec((1, Dout), lambda i: (0, 0)),
        ],
        out_specs=pl.BlockSpec((tm, Dout), lambda i: (i, 0)),
        out_shape=jax.ShapeDtypeStruct((M, Dout), out_dtype),
        compiler_params=pltpu.CompilerParams(
            dimension_semantics=("parallel",),
            vmem_limit_bytes=vmem_limit,
        ),
    )(x2d, wt, b2)


# ----------------------------------------------------------------------------
# Attention kernel: one (batch, query-tile) grid step, all heads batched.
# ----------------------------------------------------------------------------
def _attention_kernel(scale, qh_ref, kh_ref, vh_ref, mask_ref,
                      ctx_ref, attn_ref):
    """qh_ref : (1, H, TQ, depth)
       kh_ref : (1, H, S,  depth)
       vh_ref : (1, H, S,  depth)
       mask_ref : (1, 1, TQ, S)  bf16 (1.0 = masked)
       ctx_ref  : (1, H, TQ, depth)
       attn_ref : (1, H, TQ, S)
    """
    f32 = jnp.float32

    qh = qh_ref[0] * scale                       # fold 1/sqrt(depth) into q
    kh = kh_ref[0]
    vh = vh_ref[0]

    # Additive mask bias, computed once and shared across all heads.
    mbias = mask_ref[0, 0].astype(f32) * (-1e9)  # (TQ, S)

    logits = jnp.einsum("hqd,hkd->hqk", qh, kh,
                        preferred_element_type=f32)          # (H, TQ, S)
    logits = logits + mbias[None, :, :]

    logits = logits - jnp.max(logits, axis=-1, keepdims=True)
    e = jnp.exp(logits)
    denom = jnp.sum(e, axis=-1, keepdims=True)
    attn = e * pl.reciprocal(denom, approx=True)             # EUP vrcp

    attn_ref[0] = attn.astype(attn_ref.dtype)
    ctx_ref[0] = jnp.einsum("hqk,hkd->hqd", attn, vh,
                            preferred_element_type=f32).astype(ctx_ref.dtype)


# ----------------------------------------------------------------------------
# Wrapper
# ----------------------------------------------------------------------------
def multi_head_attention(q, k, v, mask, params, num_heads,
                         *, attn_dtype=jnp.float32):
    """params = dict with wq, bq, wk, bk, wv, bv, wo, bo (PyTorch Linear layout).

    Returns (output (B,S,D) float32, attention_weights (B,H,S,S) attn_dtype).
    """
    B, S, D = q.shape
    assert D % num_heads == 0
    depth = D // num_heads
    scale = 1.0 / float(np.sqrt(depth))

    # ---- projections: each done ONCE (Pallas linear), head split via XLA ----
    def project(x, w, b):
        y = _pallas_linear(x.reshape(B * S, D), w, b)
        return y.reshape(B, S, num_heads, depth).transpose(0, 2, 1, 3)

    qh = project(q, params["wq"], params["bq"])   # (B, H, S, depth)
    kh = project(k, params["wk"], params["bk"])
    vh = project(v, params["wv"], params["bv"])

    if mask is None:
        mask = jnp.zeros((1, 1, S, S), dtype=jnp.float32)
    mask_b = mask.shape[0]                        # 1 (broadcast) or B
    mask_bf16 = mask.astype(jnp.bfloat16)         # 0/1 mask is exact in bf16

    # ---- choose the query tile --------------------------------------------
    vmem_cap = _vmem_capacity()
    attn_bytes = jnp.dtype(attn_dtype).itemsize

    def tile_bytes(tq):
        blocks = (num_heads * tq * depth * 4            # qh block
                  + 2 * num_heads * S * depth * 4       # kh, vh blocks
                  + tq * S * 2                          # mask block (bf16)
                  + num_heads * tq * depth * 4          # ctx out block
                  + num_heads * tq * S * attn_bytes)    # attn out block
        live = 3 * num_heads * tq * S * 4               # logits / e / attn f32
        return 2 * blocks + live                        # double-buffered blocks

    divisors = [c for c in (512, 256, 128) if S % c == 0]
    if divisors:
        tq = next((c for c in divisors if tile_bytes(c) <= vmem_cap // 2),
                  divisors[-1])
    else:
        # TODO(synk): pad/mask the last query tile for large S not divisible
        # by 128 instead of using one full-S tile.
        tq = S
    n_qt = S // tq

    vmem_limit = int(min(max(2 * tile_bytes(tq), 32 << 20), vmem_cap))

    kernel = functools.partial(_attention_kernel, scale)

    qh_spec = pl.BlockSpec((1, num_heads, tq, depth), lambda b, t: (b, 0, t, 0))
    kv_spec = pl.BlockSpec((1, num_heads, S, depth), lambda b, t: (b, 0, 0, 0))
    if mask_b == 1:
        m_spec = pl.BlockSpec((1, 1, tq, S), lambda b, t: (0, 0, t, 0))
    else:
        m_spec = pl.BlockSpec((1, 1, tq, S), lambda b, t: (b, 0, t, 0))
    ctx_spec = pl.BlockSpec((1, num_heads, tq, depth), lambda b, t: (b, 0, t, 0))
    attn_spec = pl.BlockSpec((1, num_heads, tq, S), lambda b, t: (b, 0, t, 0))

    ctx, attn = pl.pallas_call(
        kernel,
        grid=(B, n_qt),
        in_specs=[qh_spec, kv_spec, kv_spec, m_spec],
        out_specs=[ctx_spec, attn_spec],
        out_shape=[
            jax.ShapeDtypeStruct((B, num_heads, S, depth), jnp.float32),
            jax.ShapeDtypeStruct((B, num_heads, S, S), attn_dtype),
        ],
        compiler_params=pltpu.CompilerParams(
            dimension_semantics=("parallel", "parallel"),
            vmem_limit_bytes=vmem_limit,
        ),
    )(qh, kh, vh, mask_bf16)

    # ---- merge heads (layout only) + final dense (Pallas linear) -----------
    ctx_merged = ctx.transpose(0, 2, 1, 3).reshape(B * S, D)
    out = _pallas_linear(ctx_merged, params["wo"], params["bo"]).reshape(B, S, D)
    return out, attn


# ----------------------------------------------------------------------------
# Pure-JAX reference (replicates the PyTorch forward) for verification.
# ----------------------------------------------------------------------------
def reference_mha(q, k, v, mask, params, num_heads):
    B, S, D = q.shape
    depth = D // num_heads

    def lin(x, w, b):
        return x @ w.T + b[0]

    qp = lin(q, params["wq"], params["bq"])
    kp = lin(k, params["wk"], params["bk"])
    vp = lin(v, params["wv"], params["bv"])

    def split(x):
        return x.reshape(B, S, num_heads, depth).transpose(0, 2, 1, 3)

    qh, kh, vh = split(qp), split(kp), split(vp)
    logits = jnp.einsum("bhqd,bhkd->bhqk", qh, kh) / np.sqrt(depth)
    if mask is not None:
        logits = logits + mask * (-1e9)
    attn = jax.nn.softmax(logits, axis=-1)
    ctx = jnp.einsum("bhqk,bhkd->bhqd", attn, vh)
    ctx = ctx.transpose(0, 2, 1, 3).reshape(B, S, D)
    out = lin(ctx, params["wo"], params["bo"])
    return out, attn


if __name__ == "__main__":
    B, S, d_model, num_heads = 2, 8, 32, 4

    key = jax.random.PRNGKey(0)
    keys = jax.random.split(key, 12)

    def w_init(kk):
        return (0.05 * jax.random.normal(kk, (d_model, d_model))).astype(jnp.float32)

    def b_init(kk):
        return (0.05 * jax.random.normal(kk, (1, d_model))).astype(jnp.float32)

    params = {
        "wq": w_init(keys[0]), "bq": b_init(keys[1]),
        "wk": w_init(keys[2]), "bk": b_init(keys[3]),
        "wv": w_init(keys[4]), "bv": b_init(keys[5]),
        "wo": w_init(keys[6]), "bo": b_init(keys[7]),
    }

    q = jax.random.normal(keys[8], (B, S, d_model), dtype=jnp.float32)
    k = jax.random.normal(keys[9], (B, S, d_model), dtype=jnp.float32)
    v = jax.random.normal(keys[10], (B, S, d_model), dtype=jnp.float32)

    # causal-style mask: 1.0 where attention is disallowed, 0.0 elsewhere
    causal = jnp.triu(jnp.ones((S, S), dtype=jnp.float32), k=1)
    mask = jnp.broadcast_to(causal[None, None], (B, 1, S, S))

    out, attn = multi_head_attention(q, k, v, mask, params, num_heads)
    out = jax.block_until_ready(out)
    attn = jax.block_until_ready(attn)

    ref_out, ref_attn = reference_mha(q, k, v, mask, params, num_heads)
    # Tolerances account for pl.reciprocal(approx=True) in the softmax.
    np.testing.assert_allclose(np.asarray(out), np.asarray(ref_out),
                               atol=5e-3, rtol=5e-3)
    np.testing.assert_allclose(np.asarray(attn), np.asarray(ref_attn),
                               atol=2e-3, rtol=2e-3)

    print("KERNEL_OK")
</pallas_src>

<mosaic_0001>
module attributes {stable_mosaic.version = 11 : i64} {
  func.func @_linear_kernel(%arg0: i32, %arg1: memref<16x32xf32, #tpu.memory_space<vmem>>, %arg2: memref<32x32xf32, #tpu.memory_space<vmem>>, %arg3: memref<1x32xf32, #tpu.memory_space<vmem>>, %arg4: memref<16x32xf32, #tpu.memory_space<vmem>>) attributes {dimension_semantics = [#tpu.dimension_semantics<parallel>], iteration_bounds = array<i64: 1>, scalar_prefetch = 0 : i64, scratch_operands = 0 : i64, tpu.core_type = #tpu.core_type<tc>, window_params = [{transform_indices = @transform_0, window_bounds = array<i64: 16, 32>}, {pipeline_mode = #tpu.pipeline_mode<synchronous>, transform_indices = @transform_1, window_bounds = array<i64: 32, 32>}, {pipeline_mode = #tpu.pipeline_mode<synchronous>, transform_indices = @transform_2, window_bounds = array<i64: 1, 32>}, {transform_indices = @transform_3, window_bounds = array<i64: 16, 32>}]} {
    %c0 = arith.constant 0 : index
    %c0_0 = arith.constant 0 : index
    %0 = vector.load %arg1[%c0, %c0_0] : memref<16x32xf32, #tpu.memory_space<vmem>>, vector<16x32xf32>
    %c0_1 = arith.constant 0 : index
    %c0_2 = arith.constant 0 : index
    %1 = vector.load %arg2[%c0_1, %c0_2] : memref<32x32xf32, #tpu.memory_space<vmem>>, vector<32x32xf32>
    %cst = arith.constant dense<0.000000e+00> : vector<16x32xf32>
    %2 = tpu.matmul %0, %1, %cst {dimension_numbers = #tpu.dot_dimension_numbers<[1], [0], [0], [1], [0, 0, 1, 1], [], []>} : vector<16x32xf32>, vector<32x32xf32>, vector<16x32xf32> -> vector<16x32xf32>
    %c0_3 = arith.constant 0 : index
    %c0_4 = arith.constant 0 : index
    %3 = vector.load %arg3[%c0_3, %c0_4] : memref<1x32xf32, #tpu.memory_space<vmem>>, vector<1x32xf32>
    %4 = vector.broadcast %3 : vector<1x32xf32> to vector<16x32xf32>
    %5 = arith.addf %2, %4 : vector<16x32xf32>
    %c0_5 = arith.constant 0 : index
    %c0_6 = arith.constant 0 : index
    %6 = vector.load %arg4[%c0_5, %c0_6] : memref<16x32xf32, #tpu.memory_space<vmem>>, vector<16x32xf32>
    tpu.vector_store %arg4[%c0_5, %c0_6], %5 {strides = array<i32>} : memref<16x32xf32, #tpu.memory_space<vmem>>, vector<16x32xf32>,
    return
  }
  func.func @transform_0(%arg0: i32) -> (i32, i32) {
    %c0_i32 = arith.constant 0 : i32
    %c0_i32_0 = arith.constant 0 : i32
    return %arg0, %c0_i32 : i32, i32
  }
  func.func @transform_1(%arg0: i32) -> (i32, i32) {
    %c0_i32 = arith.constant 0 : i32
    %c0_i32_0 = arith.constant 0 : i32
    %c0_i32_1 = arith.constant 0 : i32
    return %c0_i32, %c0_i32_0 : i32, i32
  }
  func.func @transform_2(%arg0: i32) -> (i32, i32) {
    %c0_i32 = arith.constant 0 : i32
    %c0_i32_0 = arith.constant 0 : i32
    %c0_i32_1 = arith.constant 0 : i32
    return %c0_i32, %c0_i32_0 : i32, i32
  }
  func.func @transform_3(%arg0: i32) -> (i32, i32) {
    %c0_i32 = arith.constant 0 : i32
    %c0_i32_0 = arith.constant 0 : i32
    return %arg0, %c0_i32 : i32, i32
  }
}

</mosaic_0001>

<bundles_post_ra>
// kernel: tpu_custom_call.1
= control target key start
LH: loop header
LB: loop body
LE: loop exit
PB: predicated region body
PF: predicated region fallthrough
CT: control target
= control target key end

     0   :  { %8 = vsyncpa [#allocation3], 0  ;;  %s299_s0 = inlined_call_operand.hbm [shape: f32[16,32], index: 0, kind: input, shape index: {}]   ;;  %s300_s1 = inlined_call_operand.hbm [shape: f32[32,32], index: 1, kind: input, shape index: {}]   ;;  %s301_s2 = inlined_call_operand.vmem [shape: f32[1,32], index: 2, kind: input, shape index: {}]   ;;  %s302_s3 = inlined_call_operand.hbm [shape: f32[16,32], index: 3, kind: output, shape index: {}]  }
   0x1   :  { %9 = vsyncpa [#allocation6], 0 }
   0x2   :  { %10 = vsyncpa [#allocation4], 0  ;;  %s249_s12 = smov [#allocation2]  }
   0x3   :  { %s16_s13 = sshll.u32 %s249_s12, 4  ;;  %s17_s13 = int_to_ptr.vmem [resolvable:$true] %s16_s13 }
   0x4   :  { %s191_s14 = scalar_lea.vmem %s17_s13, 256  ;;  %p196_p1 = scmp.lt.s32.totalorder %s17_s13, %s17_s13 }
   0x5   :  { %p192_p0 = scmp.ne.s32.totalorder %s17_s13, %s191_s14  ;;  %p197_p2 = scmp.lt.s32.totalorder %s191_s14, %s191_s14 }
   0x7   :  { %p198_p3 = por %p197_p2, %p196_p1 }
   0x9   :  { %p199_p4 = pnand %p198_p3, %p192_p0 }
   0xb   :  { %202 = shalt.err (!%p199_p4)
}
   0xc   :  { %s250_s15 = smov 128   ;;  %s251_s16 = smov 8  }
   0xd   :  { %22 = dma.hbm_to_vmem [thread:$0]  %s299_s0, 256, %s17_s13, [#allocation3], %s250_s15, %s250_s15, %s251_s16  }
   0xe   :  { %s252_s19 = smov [#allocation5]  }
   0xf   :  { %s28_s20 = sshll.u32 %s252_s19, 4  ;;  %s29_s20 = int_to_ptr.vmem [resolvable:$true] %s28_s20 }
  0x10   :  { %s211_s21 = scalar_lea.vmem %s29_s20, 512  ;;  %p216_p6 = scmp.lt.s32.totalorder %s29_s20, %s29_s20 }
  0x11   :  { %p212_p5 = scmp.ne.s32.totalorder %s29_s20, %s211_s21  ;;  %p217_p7 = scmp.lt.s32.totalorder %s211_s21, %s211_s21 }
  0x13   :  { %p218_p8 = por %p217_p7, %p216_p6 }
  0x15   :  { %p219_p9 = pnand %p218_p8, %p212_p5 }
  0x17   :  { %222 = shalt.err (!%p219_p9)
}
  0x18   :  { %34 = dma.hbm_to_vmem [thread:$0]  %s300_s1, 512, %s29_s20, [#allocation6], %s250_s15, %s250_s15, %s251_s16  }
  0x19   :  { %243 = dma.done.wait [#allocation3], 256  }
  0x1a   :  { %244 = vsyncadd [#allocation3], 4294967040 }
  0x1b   :  { %245 = dma.done.wait [#allocation6], 512  }
  0x1c   :  { %246 = vsyncadd [#allocation6], 4294966784  ;;  %vm56_vm0 = vcmask 261120   ;;  %v48_v0 = vld [vmem:[#allocation5 + $0x18] sm:$0xff]  ;;  %v47_v1 = vld [vmem:[#allocation5 + $0x10] sm:$0xff]  ;;  %s253_s24 = smov [#allocation7]  }
  0x1d   :  { %167 = vmatprep.subr.mxu0 %v48_v0  ;;  %v43_v2 = vld [vmem:[#allocation2] sm:$0xff]  ;;  %v46_v3 = vld [vmem:[#allocation5 + $0x8] sm:$0xff]  ;;  %v45_v4 = vld [vmem:[#allocation5] sm:$0xff]  ;;  %s145_s25 = sshll.u32 %s253_s24, 4  ;;  %s146_s25 = int_to_ptr.vmem [resolvable:$true] %s145_s25 }
  0x1e   :  { %168 = vmatpush3.msra.mxu0 %v48_v0  ;;  %175 = vmatprep.mubr.msk.f32.mxu0 %vm56_vm0, %v43_v2  ;;  %v44_v5 = vld [vmem:[#allocation2 + $0x8] sm:$0xff]  ;;  %v158_v6 = vld [vmem:[%s301_s2] ss:$0 sm:$0xff]  ;;  %s223_s26 = scalar_lea.vmem %s146_s25, 256  ;;  %p228_p11 = scmp.lt.s32.totalorder %s146_s25, %s146_s25 }
  0x1f   :  { %169 = vmatprep.subr.mxu0 %v47_v1  ;;  %p224_p10 = scmp.ne.s32.totalorder %s146_s25, %s223_s26  ;;  %p229_p12 = scmp.lt.s32.totalorder %s223_s26, %s223_s26 }
  0x20   :  { %170 = vmatpush3.msra.mxu0 %v47_v1 }
  0x21   :  { %171 = vmatprep.subr.mxu0 %v46_v3  ;;  %p230_p13 = por %p229_p12, %p228_p11 }
  0x22   :  { %172 = vmatpush3.msra.mxu0 %v46_v3 }
  0x23   :  { %173 = vmatprep.subr.mxu0 %v45_v4  ;;  %p231_p0 = pnand %p230_p13, %p224_p10 }
  0x24   :  { %174 = vmatpush3.msra.mxu0 %v45_v4 }
  0x25   :  { %176 = vmatmul.mubr.msk.f32.vlgmr.msra.gmra.mxu0 %vm56_vm0, %v44_v5 }
  0xe5   :  { %v177_v7 = vpop.f32.mrf.mxu0 }
  0xe6   :  { %v135_v8 = vadd.f32 %v177_v7, %v158_v6 }
  0xe7   :  { %v129_v9 = vpop.f32.mrf.mxu0 }
  0xe8   :  { %139 = vst.msk [vmem:[#allocation7 + $0x8] sm:$0xff] %vm56_vm0, %v135_v8  ;;  %v130_v10 = vadd.f32 %v158_v6, %v129_v9 }
  0xea   :  { %138 = vst.msk [vmem:[#allocation7] sm:$0xff] %vm56_vm0, %v130_v10 }
  0xeb   :  { %234 = shalt.err (!%p231_p0)
}
  0xec   :  { %151 = dma.vmem_to_hbm [thread:$0]  %s146_s25, 256, %s302_s3, [#allocation4], %s250_s15, %s250_s15, %s251_s16  }
  0xed   :  { %247 = dma.done.wait [#allocation4], 256  }
  0xee   :  { %248 = vsyncadd [#allocation4], 4294967040 }
  0xef   :  { %155 = vsyncpa [#allocation3], 1 }
  0xf0   :  { %156 = vsyncpa [#allocation6], 1 }
  0xf1   :  { %157 = vsyncpa [#allocation4], 1 }

</bundles_post_ra>
